<compile_context>
chip_gen: v7x
topology: tpu7x:2x2x1
jax: 0.10.0
libtpu: 0.0.40
codegen_flags: <defaults>
</compile_context>

<pallas_src>
import functools

import jax
import jax.numpy as jnp
import numpy as np
from jax.experimental import pallas as pl
from jax.experimental.pallas import tpu as pltpu

_LANE = 128
_SUB = 8
_H1P = 128          # hidden 20 padded to lane width
_H2P = 128          # hidden 10 padded to lane width
_MAX_TILE_B = 1024  # batch rows per grid step (multiple of 8; ~0.5 MiB/buffer -> safe on v5e/v6e/v7x)


def _round_up(x, m):
    return (x + m - 1) // m * m


def _make_mlp_kernel(k1_outer_product: bool):
    """Entire 3-layer MLP forward for one batch tile (all operands in VMEM)."""

    def kernel(x_ref, w1_ref, b1_ref, w2_ref, b2_ref, w3_ref, b3_ref, o_ref):
        x = x_ref[...]
        if k1_outer_product:
            # (tb, 1) * (1, H1P) broadcast -> (tb, H1P) on the VPU.  Avoids a
            # zero-stuffed K=128 MXU dot and 128x input padding/DMA.
            h1 = x * w1_ref[...] + b1_ref[...]
        else:
            h1 = jnp.dot(x, w1_ref[...], preferred_element_type=jnp.float32) + b1_ref[...]
        h1 = jnp.maximum(h1, 0.0)                      # ReLU
        h2 = jnp.dot(h1, w2_ref[...], preferred_element_type=jnp.float32) + b2_ref[...]
        h2 = jnp.maximum(h2, 0.0)                      # ReLU
        y = jnp.dot(h2, w3_ref[...], preferred_element_type=jnp.float32) + b3_ref[...]
        o_ref[...] = y.astype(o_ref.dtype)

    return kernel


def init_mlp_params(key, input_dim, output_dim, dtype=jnp.float32):
    """Deterministic init mimicking torch.nn.Linear default (U(-1/sqrt(in), 1/sqrt(in)))."""
    dims = [(input_dim, 20), (20, 10), (10, output_dim)]
    params = {}
    for i, (fan_in, fan_out) in enumerate(dims, start=1):
        key, kw, kb = jax.random.split(key, 3)
        bound = 1.0 / np.sqrt(fan_in)
        # stored as (in, out) == torch weight.T
        params[f"w{i}"] = jax.random.uniform(
            kw, (fan_in, fan_out), dtype, minval=-bound, maxval=bound)
        params[f"b{i}"] = jax.random.uniform(
            kb, (fan_out,), dtype, minval=-bound, maxval=bound)
    return params


def prepare_mlp_params(params):
    """One-time parameter prep (hoisted OUT of the per-call forward path).

    Pads weights/biases to 128-lane tiles; layout (in, out) == torch weight.T.
    When input_dim == 1 the first weight stays a (1, 128) row (no K padding).
    """
    input_dim = int(params["w1"].shape[0])
    output_dim = int(params["w3"].shape[1])
    ip = 1 if input_dim == 1 else _round_up(input_dim, _LANE)
    op = _round_up(max(output_dim, 1), _LANE)

    def pad2d(a, rows, cols):
        a = jnp.asarray(a, jnp.float32)
        return jnp.zeros((rows, cols), jnp.float32).at[: a.shape[0], : a.shape[1]].set(a)

    prepped = {
        "w1": pad2d(params["w1"], ip, _H1P),
        "b1": pad2d(params["b1"][None, :], 1, _H1P),
        "w2": pad2d(params["w2"], _H1P, _H2P),
        "b2": pad2d(params["b2"][None, :], 1, _H2P),
        "w3": pad2d(params["w3"], _H2P, op),
        "b3": pad2d(params["b3"][None, :], 1, op),
    }
    meta = dict(input_dim=input_dim, output_dim=output_dim, ip=ip, op=op)
    return prepped, meta


@functools.partial(jax.jit, static_argnames=("input_dim", "output_dim", "ip", "op"))
def mlp_forward(x, prepped, *, input_dim, output_dim, ip, op):
    """x: (batch, ...) -> flattened to (batch, input_dim) like torch's x.view(B, -1)."""
    batch = x.shape[0]
    x2d = x.reshape(batch, -1).astype(jnp.float32)

    # Batch tiling: single tile for small batches, 1-D "parallel" grid otherwise.
    bp8 = _round_up(max(batch, 1), _SUB)
    if bp8 <= _MAX_TILE_B:
        tile_b, bp = bp8, bp8
    else:
        tile_b = _MAX_TILE_B
        bp = _round_up(batch, _MAX_TILE_B)
    grid = (bp // tile_b,)

    # Pad input rows to bp; feature dim only padded when input_dim > 1.
    xp = jnp.zeros((bp, ip), jnp.float32).at[:batch, :input_dim].set(x2d)

    kernel = _make_mlp_kernel(k1_outer_product=(input_dim == 1))

    def const_spec(shape):
        # Weights/biases: same block every grid step -> stay VMEM-resident.
        return pl.BlockSpec(shape, lambda i: (0, 0))

    out_padded = pl.pallas_call(
        kernel,
        out_shape=jax.ShapeDtypeStruct((bp, op), jnp.float32),
        grid=grid,
        in_specs=[
            pl.BlockSpec((tile_b, ip), lambda i: (i, 0)),   # x: tiled over batch
            const_spec((ip, _H1P)),
            const_spec((1, _H1P)),
            const_spec((_H1P, _H2P)),
            const_spec((1, _H2P)),
            const_spec((_H2P, op)),
            const_spec((1, op)),
        ],
        out_specs=pl.BlockSpec((tile_b, op), lambda i: (i, 0)),
        compiler_params=pltpu.CompilerParams(
            dimension_semantics=("parallel",)),   # shards batch grid across v7x's 2 TCs
    )(xp, prepped["w1"], prepped["b1"], prepped["w2"], prepped["b2"],
      prepped["w3"], prepped["b3"])

    return out_padded[:batch, :output_dim]


def mlp_reference(x, params):
    """Pure-JAX reference for correctness checking."""
    x2d = x.reshape(x.shape[0], -1).astype(jnp.float32)
    h1 = jnp.maximum(x2d @ params["w1"] + params["b1"], 0.0)
    h2 = jnp.maximum(h1 @ params["w2"] + params["b2"], 0.0)
    return h2 @ params["w3"] + params["b3"]


if __name__ == "__main__":
    # The surrounding script instantiates MLP(1, 1) inside DemCurve, so
    # input_dim = output_dim = 1; use a small batch.
    input_dim, output_dim, batch = 1, 1, 4

    key = jax.random.PRNGKey(0)
    key, kx = jax.random.split(key)
    params = init_mlp_params(key, input_dim, output_dim)
    x = jax.random.normal(kx, (batch, input_dim), jnp.float32)

    # One-time parameter prep, hoisted out of the forward hot path.
    prepped, meta = prepare_mlp_params(params)
    prepped = jax.block_until_ready(prepped)

    y = mlp_forward(x, prepped, **meta)
    y = jax.block_until_ready(y)

    y_ref = mlp_reference(x, params)
    np.testing.assert_allclose(np.asarray(y), np.asarray(y_ref), rtol=1e-5, atol=1e-5)

    print("KERNEL_OK")
</pallas_src>

<mosaic_0001>
module attributes {stable_mosaic.version = 11 : i64} {
  func.func @kernel(%arg0: i32, %arg1: memref<8x1xf32, #tpu.memory_space<vmem>>, %arg2: memref<1x128xf32, #tpu.memory_space<vmem>>, %arg3: memref<1x128xf32, #tpu.memory_space<vmem>>, %arg4: memref<128x128xf32, #tpu.memory_space<vmem>>, %arg5: memref<1x128xf32, #tpu.memory_space<vmem>>, %arg6: memref<128x128xf32, #tpu.memory_space<vmem>>, %arg7: memref<1x128xf32, #tpu.memory_space<vmem>>, %arg8: memref<8x128xf32, #tpu.memory_space<vmem>>) attributes {dimension_semantics = [#tpu.dimension_semantics<parallel>], iteration_bounds = array<i64: 1>, scalar_prefetch = 0 : i64, scratch_operands = 0 : i64, tpu.core_type = #tpu.core_type<tc>, window_params = [{transform_indices = @transform_0, window_bounds = array<i64: 8, 1>}, {pipeline_mode = #tpu.pipeline_mode<synchronous>, transform_indices = @transform_1, window_bounds = array<i64: 1, 128>}, {pipeline_mode = #tpu.pipeline_mode<synchronous>, transform_indices = @transform_2, window_bounds = array<i64: 1, 128>}, {pipeline_mode = #tpu.pipeline_mode<synchronous>, transform_indices = @transform_3, window_bounds = array<i64: 128, 128>}, {pipeline_mode = #tpu.pipeline_mode<synchronous>, transform_indices = @transform_4, window_bounds = array<i64: 1, 128>}, {pipeline_mode = #tpu.pipeline_mode<synchronous>, transform_indices = @transform_5, window_bounds = array<i64: 128, 128>}, {pipeline_mode = #tpu.pipeline_mode<synchronous>, transform_indices = @transform_6, window_bounds = array<i64: 1, 128>}, {transform_indices = @transform_7, window_bounds = array<i64: 8, 128>}]} {
    %c0 = arith.constant 0 : index
    %c0_0 = arith.constant 0 : index
    %0 = vector.load %arg1[%c0, %c0_0] : memref<8x1xf32, #tpu.memory_space<vmem>>, vector<8x1xf32>
    %c0_1 = arith.constant 0 : index
    %c0_2 = arith.constant 0 : index
    %1 = vector.load %arg2[%c0_1, %c0_2] : memref<1x128xf32, #tpu.memory_space<vmem>>, vector<1x128xf32>
    %2 = vector.broadcast %0 : vector<8x1xf32> to vector<8x128xf32>
    %3 = vector.broadcast %1 : vector<1x128xf32> to vector<8x128xf32>
    %4 = arith.mulf %2, %3 : vector<8x128xf32>
    %c0_3 = arith.constant 0 : index
    %c0_4 = arith.constant 0 : index
    %5 = vector.load %arg3[%c0_3, %c0_4] : memref<1x128xf32, #tpu.memory_space<vmem>>, vector<1x128xf32>
    %6 = vector.broadcast %5 : vector<1x128xf32> to vector<8x128xf32>
    %7 = arith.addf %4, %6 : vector<8x128xf32>
    %cst = arith.constant 0.000000e+00 : f32
    %8 = vector.broadcast %cst : f32 to vector<8x128xf32>
    %9 = arith.maximumf %7, %8 : vector<8x128xf32>
    %c0_5 = arith.constant 0 : index
    %c0_6 = arith.constant 0 : index
    %10 = vector.load %arg4[%c0_5, %c0_6] : memref<128x128xf32, #tpu.memory_space<vmem>>, vector<128x128xf32>
    %cst_7 = arith.constant dense<0.000000e+00> : vector<8x128xf32>
    %11 = tpu.matmul %9, %10, %cst_7 {dimension_numbers = #tpu.dot_dimension_numbers<[1], [0], [0], [1], [0, 0, 1, 1], [], []>} : vector<8x128xf32>, vector<128x128xf32>, vector<8x128xf32> -> vector<8x128xf32>
    %c0_8 = arith.constant 0 : index
    %c0_9 = arith.constant 0 : index
    %12 = vector.load %arg5[%c0_8, %c0_9] : memref<1x128xf32, #tpu.memory_space<vmem>>, vector<1x128xf32>
    %13 = vector.broadcast %12 : vector<1x128xf32> to vector<8x128xf32>
    %14 = arith.addf %11, %13 : vector<8x128xf32>
    %cst_10 = arith.constant 0.000000e+00 : f32
    %15 = vector.broadcast %cst_10 : f32 to vector<8x128xf32>
    %16 = arith.maximumf %14, %15 : vector<8x128xf32>
    %c0_11 = arith.constant 0 : index
    %c0_12 = arith.constant 0 : index
    %17 = vector.load %arg6[%c0_11, %c0_12] : memref<128x128xf32, #tpu.memory_space<vmem>>, vector<128x128xf32>
    %cst_13 = arith.constant dense<0.000000e+00> : vector<8x128xf32>
    %18 = tpu.matmul %16, %17, %cst_13 {dimension_numbers = #tpu.dot_dimension_numbers<[1], [0], [0], [1], [0, 0, 1, 1], [], []>} : vector<8x128xf32>, vector<128x128xf32>, vector<8x128xf32> -> vector<8x128xf32>
    %c0_14 = arith.constant 0 : index
    %c0_15 = arith.constant 0 : index
    %19 = vector.load %arg7[%c0_14, %c0_15] : memref<1x128xf32, #tpu.memory_space<vmem>>, vector<1x128xf32>
    %20 = vector.broadcast %19 : vector<1x128xf32> to vector<8x128xf32>
    %21 = arith.addf %18, %20 : vector<8x128xf32>
    %c0_16 = arith.constant 0 : index
    %c0_17 = arith.constant 0 : index
    %22 = vector.load %arg8[%c0_16, %c0_17] : memref<8x128xf32, #tpu.memory_space<vmem>>, vector<8x128xf32>
    tpu.vector_store %arg8[%c0_16, %c0_17], %21 {strides = array<i32>} : memref<8x128xf32, #tpu.memory_space<vmem>>, vector<8x128xf32>,
    return
  }
  func.func @transform_0(%arg0: i32) -> (i32, i32) {
    %c0_i32 = arith.constant 0 : i32
    %c0_i32_0 = arith.constant 0 : i32
    return %arg0, %c0_i32 : i32, i32
  }
  func.func @transform_1(%arg0: i32) -> (i32, i32) {
    %c0_i32 = arith.constant 0 : i32
    %c0_i32_0 = arith.constant 0 : i32
    %c0_i32_1 = arith.constant 0 : i32
    return %c0_i32, %c0_i32_0 : i32, i32
  }
  func.func @transform_2(%arg0: i32) -> (i32, i32) {
    %c0_i32 = arith.constant 0 : i32
    %c0_i32_0 = arith.constant 0 : i32
    %c0_i32_1 = arith.constant 0 : i32
    return %c0_i32, %c0_i32_0 : i32, i32
  }
  func.func @transform_3(%arg0: i32) -> (i32, i32) {
    %c0_i32 = arith.constant 0 : i32
    %c0_i32_0 = arith.constant 0 : i32
    %c0_i32_1 = arith.constant 0 : i32
    return %c0_i32, %c0_i32_0 : i32, i32
  }
  func.func @transform_4(%arg0: i32) -> (i32, i32) {
    %c0_i32 = arith.constant 0 : i32
    %c0_i32_0 = arith.constant 0 : i32
    %c0_i32_1 = arith.constant 0 : i32
    return %c0_i32, %c0_i32_0 : i32, i32
  }
  func.func @transform_5(%arg0: i32) -> (i32, i32) {
    %c0_i32 = arith.constant 0 : i32
    %c0_i32_0 = arith.constant 0 : i32
    %c0_i32_1 = arith.constant 0 : i32
    return %c0_i32, %c0_i32_0 : i32, i32
  }
  func.func @transform_6(%arg0: i32) -> (i32, i32) {
    %c0_i32 = arith.constant 0 : i32
    %c0_i32_0 = arith.constant 0 : i32
    %c0_i32_1 = arith.constant 0 : i32
    return %c0_i32, %c0_i32_0 : i32, i32
  }
  func.func @transform_7(%arg0: i32) -> (i32, i32) {
    %c0_i32 = arith.constant 0 : i32
    %c0_i32_0 = arith.constant 0 : i32
    return %arg0, %c0_i32 : i32, i32
  }
}

</mosaic_0001>

<bundles_post_ra>
// kernel: mlp_forward.1
= control target key start
LH: loop header
LB: loop body
LE: loop exit
PB: predicated region body
PF: predicated region fallthrough
CT: control target
= control target key end

     0   :  { %12 = vsyncpa [#allocation3], 0  ;;  %s590_s0 = inlined_call_operand.vmem [shape: f32[8,1], index: 0, kind: input, shape index: {}]   ;;  %s591_s1 = inlined_call_operand.vmem [shape: f32[1,128], index: 1, kind: input, shape index: {}]   ;;  %s592_s2 = inlined_call_operand.vmem [shape: f32[1,128], index: 2, kind: input, shape index: {}]   ;;  %s593_s3 = inlined_call_operand.hbm [shape: f32[128,128], index: 3, kind: input, shape index: {}]   ;;  %s594_s4 = inlined_call_operand.vmem [shape: f32[1,128], index: 4, kind: input, shape index: {}]   ;;  %s595_s5 = inlined_call_operand.hbm [shape: f32[128,128], index: 5, kind: input, shape index: {}]   ;;  %s596_s6 = inlined_call_operand.vmem [shape: f32[1,128], index: 6, kind: input, shape index: {}]   ;;  %s597_s7 = inlined_call_operand.vmem [shape: f32[8,128], index: 7, kind: output, shape index: {}]  }
   0x1   :  { %13 = vsyncpa [#allocation5], 0  ;;  %s484_s24 = smov [#allocation2]   ;;  %s436_s28 = scalar_lea.hbm %s593_s3, 2048 }
   0x2   :  { %s25_s25 = sshll.u32 %s484_s24, 4  ;;  %p437_p0 = scmp.ne.s32.totalorder %s593_s3, %s436_s28  ;;  %s26_s25 = int_to_ptr.vmem [resolvable:$true] %s25_s25 }
   0x3   :  { %p440_p1 = scmp.lt.u32.totalorder %s436_s28, %s593_s3 }
   0x5   :  { %p442_p2 = pnand %p440_p1, %p437_p0 }
   0x7   :  { %445 = shalt.err (!%p442_p2)
}
   0x8   :  { %s446_s10 = scalar_lea.vmem %s26_s25, 2048  ;;  %p451_p4 = scmp.lt.s32.totalorder %s26_s25, %s26_s25 }
   0x9   :  { %p447_p3 = scmp.ne.s32.totalorder %s26_s25, %s446_s10  ;;  %p452_p5 = scmp.lt.s32.totalorder %s446_s10, %s446_s10 }
   0xb   :  { %p453_p6 = por %p452_p5, %p451_p4 }
   0xd   :  { %p454_p7 = pnand %p453_p6, %p447_p3 }
   0xf   :  { %457 = shalt.err (!%p454_p7)
}
  0x10   :  { %s485_s11 = smov 128   ;;  %s486_s12 = smov 8  }
  0x11   :  { %31 = dma.hbm_to_vmem [thread:$0]  %s593_s3, 2048, %s26_s25, [#allocation3], %s485_s11, %s485_s11, %s486_s12  }
  0x12   :  { %s487_s15 = smov [#allocation4]   ;;  %s458_s19 = scalar_lea.hbm %s595_s5, 2048 }
  0x13   :  { %s39_s16 = sshll.u32 %s487_s15, 4  ;;  %p459_p8 = scmp.ne.s32.totalorder %s595_s5, %s458_s19  ;;  %s40_s16 = int_to_ptr.vmem [resolvable:$true] %s39_s16 }
  0x14   :  { %p462_p9 = scmp.lt.u32.totalorder %s458_s19, %s595_s5 }
  0x16   :  { %p464_p10 = pnand %p462_p9, %p459_p8 }
  0x18   :  { %467 = shalt.err (!%p464_p10)
}
  0x19   :  { %s468_s24 = scalar_lea.vmem %s40_s16, 2048  ;;  %p473_p12 = scmp.lt.s32.totalorder %s40_s16, %s40_s16 }
  0x1a   :  { %p469_p11 = scmp.ne.s32.totalorder %s40_s16, %s468_s24  ;;  %p474_p13 = scmp.lt.s32.totalorder %s468_s24, %s468_s24 }
  0x1c   :  { %p475_p0 = por %p474_p13, %p473_p12 }
  0x1e   :  { %p476_p1 = pnand %p475_p0, %p469_p11 }
  0x20   :  { %479 = shalt.err (!%p476_p1)
}
  0x21   :  { %45 = dma.hbm_to_vmem [thread:$0]  %s595_s5, 2048, %s40_s16, [#allocation5], %s485_s11, %s485_s11, %s486_s12  }
  0x22   :  { %480 = dma.done.wait [#allocation3], 2048  }
  0x23   :  { %481 = vsyncadd [#allocation3], 4294965248 }
  0x24   :  { %482 = dma.done.wait [#allocation5], 2048  }
  0x25   :  { %483 = vsyncadd [#allocation5], 4294965248  ;;  %v488_v0 = vmov 0   ;;  %v489_v1 = vmov 0.0|0.0   ;;  %v54_v2 = vld [vmem:[%s590_s0] sm:$0xff]  ;;  %v78_v4 = vld [vmem:[#allocation2 + $0x8] sm:$0xff] }
  0x26   :  { %435 = vset.pattern.permute.xlu0 %v488_v0  ;;  %379 = vmatprep.subr.bf16.mxu0 %v489_v1  ;;  %v77_v3 = vld [vmem:[#allocation2] sm:$0xff]  ;;  %v79_v6 = vld [vmem:[#allocation2 + $0x10] sm:$0xff]  ;;  %v80_v7 = vld [vmem:[#allocation2 + $0x18] sm:$0xff]  ;;  %vm490_vm0 = vmmov 0   ;;  %v491_v12 = vmov 0.0  }
  0x27   :  { %403 = vmatprep.subr.bf16.mxu1 %v489_v1  ;;  %58 = vperm.xlu0 %435, %v54_v2   ;;  %v380_v5 = vpack.c.bf16 %v78_v4, %v77_v3  ;;  %v383_v8 = vpack.c.bf16 %v80_v7, %v79_v6  ;;  %v81_v9 = vld [vmem:[#allocation2 + $0x20] sm:$0xff]  ;;  %v82_v10 = vld [vmem:[#allocation2 + $0x28] sm:$0xff]  ;;  %v173_v15 = vld [vmem:[#allocation4 + $0x10] sm:$0xff] }
  0x28   :  { %v386_v11 = vpack.c.bf16 %v82_v10, %v81_v9  ;;  %341 = vmatprep.mubr.msk.f32.mxu0 %vm490_vm0, %v491_v12  ;;  %v171_v13 = vld [vmem:[#allocation4] sm:$0xff]  ;;  %v172_v14 = vld [vmem:[#allocation4 + $0x8] sm:$0xff]  ;;  %v83_v16 = vld [vmem:[#allocation2 + $0x30] sm:$0xff]  ;;  %376 = vmatprep.mubr.msk.f32.mxu1 %vm490_vm0, %v491_v12 }
  0x29   :  { %381 = vmatpush3.bf16.msra.mxu0 %v380_v5  ;;  %v84_v17 = vld [vmem:[#allocation2 + $0x38] sm:$0xff]  ;;  %v404_v18 = vpack.c.bf16 %v172_v14, %v171_v13  ;;  %v175_v22 = vld [vmem:[#allocation4 + $0x20] sm:$0xff]  ;;  %v176_v23 = vld [vmem:[#allocation4 + $0x28] sm:$0xff] }
  0x2a   :  { %382 = vmatprep.subr.bf16.mxu0 %v489_v1  ;;  %v174_v19 = vld [vmem:[#allocation4 + $0x18] sm:$0xff]  ;;  %v389_v21 = vpack.c.bf16 %v84_v17, %v83_v16  ;;  %v85_v24 = vld [vmem:[#allocation2 + $0x40] sm:$0xff]  ;;  %v86_v25 = vld [vmem:[#allocation2 + $0x48] sm:$0xff]  ;;  %v410_v26 = vpack.c.bf16 %v176_v23, %v175_v22 }
  0x2b   :  { %405 = vmatpush3.bf16.msra.mxu1 %v404_v18  ;;  %v407_v20 = vpack.c.bf16 %v174_v19, %v173_v15  ;;  %v392_v27 = vpack.c.bf16 %v86_v25, %v85_v24  ;;  %v177_v28 = vld [vmem:[#allocation4 + $0x30] sm:$0xff]  ;;  %v178_v29 = vld [vmem:[#allocation4 + $0x38] sm:$0xff]  ;;  %v179_v34 = vld [vmem:[#allocation4 + $0x40] sm:$0xff] }
  0x2c   :  { %406 = vmatprep.subr.bf16.mxu1 %v489_v1  ;;  %v87_v30 = vld [vmem:[#allocation2 + $0x50] sm:$0xff]  ;;  %v88_v31 = vld [vmem:[#allocation2 + $0x58] sm:$0xff]  ;;  %v413_v32 = vpack.c.bf16 %v178_v29, %v177_v28  ;;  %v180_v35 = vld [vmem:[#allocation4 + $0x48] sm:$0xff] }
  0x2d   :  { %384 = vmatpush3.bf16.msra.mxu0 %v383_v8  ;;  %v395_v33 = vpack.c.bf16 %v88_v31, %v87_v30  ;;  %v89_v36 = vld [vmem:[#allocation2 + $0x60] sm:$0xff]  ;;  %v90_v37 = vld [vmem:[#allocation2 + $0x68] sm:$0xff]  ;;  %v416_v38 = vpack.c.bf16 %v180_v35, %v179_v34  ;;  %v181_v40 = vld [vmem:[#allocation4 + $0x50] sm:$0xff] }
  0x2e   :  { %385 = vmatprep.subr.bf16.mxu0 %v489_v1  ;;  %v398_v39 = vpack.c.bf16 %v90_v37, %v89_v36  ;;  %v182_v41 = vld [vmem:[#allocation4 + $0x58] sm:$0xff]  ;;  %v91_v42 = vld [vmem:[#allocation2 + $0x70] sm:$0xff]  ;;  %v183_v46 = vld [vmem:[#allocation4 + $0x60] sm:$0xff] }
  0x2f   :  { %408 = vmatpush3.bf16.msra.mxu1 %v407_v20  ;;  %v92_v43 = vld [vmem:[#allocation2 + $0x78] sm:$0xff]  ;;  %v419_v44 = vpack.c.bf16 %v182_v41, %v181_v40  ;;  %v184_v47 = vld [vmem:[#allocation4 + $0x68] sm:$0xff]  ;;  %v271_v49 = vld [vmem:[%s591_s1] ss:$0 sm:$0xff] }
  0x30   :  { %409 = vmatprep.subr.bf16.mxu1 %v489_v1  ;;  %v401_v45 = vpack.c.bf16 %v92_v43, %v91_v42  ;;  %v422_v48 = vpack.c.bf16 %v184_v47, %v183_v46  ;;  %v272_v50 = vld [vmem:[%s592_s2] ss:$0 sm:$0xff]  ;;  %v185_v55 = vld [vmem:[#allocation4 + $0x70] sm:$0xff]  ;;  %v186_v56 = vld [vmem:[#allocation4 + $0x78] sm:$0xff] }
  0x31   :  { %387 = vmatpush3.bf16.msra.mxu0 %v386_v11  ;;  %v425_v57 = vpack.c.bf16 %v186_v56, %v185_v55  ;;  %v273_v58 = vld [vmem:[%s594_s4] ss:$0 sm:$0xff] }
  0x32   :  { %388 = vmatprep.subr.bf16.mxu0 %v489_v1  ;;  %v274_v63 = vld [vmem:[%s596_s6] ss:$0 sm:$0xff] }
  0x33   :  { %411 = vmatpush3.bf16.msra.mxu1 %v410_v26 }
  0x34   :  { %412 = vmatprep.subr.bf16.mxu1 %v489_v1 }
  0x35   :  { %390 = vmatpush3.bf16.msra.mxu0 %v389_v21 }
  0x36   :  { %391 = vmatprep.subr.bf16.mxu0 %v489_v1 }
  0x37   :  { %414 = vmatpush3.bf16.msra.mxu1 %v413_v32 }
  0x38   :  { %415 = vmatprep.subr.bf16.mxu1 %v489_v1 }
  0x39   :  { %393 = vmatpush3.bf16.msra.mxu0 %v392_v27 }
  0x3a   :  { %394 = vmatprep.subr.bf16.mxu0 %v489_v1 }
  0x3b   :  { %417 = vmatpush3.bf16.msra.mxu1 %v416_v38 }
  0x3c   :  { %418 = vmatprep.subr.bf16.mxu1 %v489_v1 }
  0x3d   :  { %396 = vmatpush3.bf16.msra.mxu0 %v395_v33 }
  0x3e   :  { %397 = vmatprep.subr.bf16.mxu0 %v489_v1 }
  0x3f   :  { %420 = vmatpush3.bf16.msra.mxu1 %v419_v44 }
  0x40   :  { %421 = vmatprep.subr.bf16.mxu1 %v489_v1 }
  0x41   :  { %399 = vmatpush3.bf16.msra.mxu0 %v398_v39 }
  0x42   :  { %400 = vmatprep.subr.bf16.mxu0 %v489_v1 }
  0x43   :  { %423 = vmatpush3.bf16.msra.mxu1 %v422_v48 }
  0x44   :  { %424 = vmatprep.subr.bf16.mxu1 %v489_v1 }
  0x45   :  { %402 = vmatpush3.bf16.msra.mxu0 %v401_v45 }
  0x47   :  { %426 = vmatpush3.bf16.msra.mxu1 %v425_v57 }
  0xa6   :  { %v59_v51 = vpop.permute.xlu0 %58 }
  0xa7   :  { %v67_v52 = vmul.f32 %v271_v49, %v59_v51 }
  0xa9   :  { %v75_v53 = vadd.f32 %v272_v50, %v67_v52 }
  0xab   :  { %v76_v54 = vmax.f32 %v75_v53, 0.0 }
  0xad   :  { %342 = vmatmul.mubr.f32.vlgmr.msra.gmra.mrb[0].mxu0 %v76_v54 }
 0x180   :  { %v166_v59 = vpop.f32.mrb[0].mxu0 }
 0x181   :  { %v167_v60 = vadd.f32 %v273_v58, %v166_v59  ;;  %v343_v61 = vpop.f32.mrb[1].mxu0 }
 0x183   :  { %v170_v62 = vmax.f32 %v167_v60, 0.0 }
 0x185   :  { %377 = vmatmul.mubr.f32.vlgmr.msra.gmra.mrb[0].mxu1 %v170_v62 }
 0x258   :  { %v260_v0 = vpop.f32.mrb[0].mxu1 }
 0x259   :  { %v261_v1 = vadd.f32 %v274_v63, %v260_v0  ;;  %v378_v2 = vpop.f32.mrb[1].mxu1 }
 0x25b   :  { %264 = vst [vmem:[%s597_s7] sm:$0xff] %v261_v1 }
 0x25c   :  { %269 = vsyncpa [#allocation3], 1 }
 0x25d   :  { %270 = vsyncpa [#allocation5], 1 }

</bundles_post_ra>
